<compile_context>
chip_gen: v7x
topology: tpu7x:2x2x1
jax: 0.10.0
libtpu: 0.0.40
codegen_flags: <defaults>
</compile_context>

<pallas_src>
import functools
import math

import jax
import jax.numpy as jnp
from jax.experimental import pallas as pl
from jax.experimental.pallas import tpu as pltpu


# ---------------------------------------------------------------------------
# helpers
# ---------------------------------------------------------------------------
def _round_up(x, m):
    return (x + m - 1) // m * m


def _divisor_tile(dim, cap):
    """Largest multiple of 128 that divides `dim` and is <= cap (dim % 128 == 0)."""
    t = min(dim, cap)
    t -= t % 128
    t = max(t, 128)
    while dim % t:
        t -= 128
    return t


def _prop_vmem_budget(tm, tk, d):
    g = tm * tk * 2          # bf16 G tile
    e = tk * d * 2           # bf16 E tile
    a_in = tm * d * 4        # f32 layer-acc in
    e_out = tm * d * 2       # bf16 E out
    a_out = tm * d * 4       # f32 layer-acc out
    scratch = tm * d * 4     # f32 accumulator scratch
    # double-buffered inputs/outputs + scratch
    return 2 * (g + e + a_in + e_out + a_out) + scratch


# ---------------------------------------------------------------------------
# Kernel 1: fused graph propagation + layer accumulation
#   e_out   = G @ e                       (the torch.sparse.mm of the reference)
#   acc_out = (acc_in + G @ e) * scale    (running sum for the layer mean;
#                                          scale folds the final mean in)
# grid = (M // tm, K // tk); reduction axis (k) last, outputs resident across k.
# ---------------------------------------------------------------------------
def _prop_kernel(g_ref, e_ref, accin_ref, eout_ref, accout_ref, acc_ref, *, scale):
    k = pl.program_id(1)

    @pl.when(k == 0)
    def _():
        acc_ref[...] = jnp.zeros_like(acc_ref)

    acc_ref[...] += jnp.dot(
        g_ref[...], e_ref[...], preferred_element_type=jnp.float32
    )

    @pl.when(k == pl.num_programs(1) - 1)
    def _():
        e_new = acc_ref[...]
        eout_ref[...] = e_new.astype(eout_ref.dtype)          # bf16 for next layer
        acc_new = accin_ref[...] + e_new                      # f32 layer sum
        if scale != 1.0:
            acc_new = acc_new * scale
        accout_ref[...] = acc_new


def propagate_layer(g_bf16, e_bf16, acc_f32, *, scale=1.0):
    M, K = g_bf16.shape
    D = e_bf16.shape[1]

    # Tile selection: full-D lane-dense output tile; big M/K tiles for HBM roofline.
    tm = _divisor_tile(M, 512)
    if M // tm < 2 and M >= 256:
        tm = M // 2          # keep >= 2 parallel i-blocks so both v7x cores get work
    tk = _divisor_tile(K, 2048)
    while _prop_vmem_budget(tm, tk, D) > (20 << 20) and tk > 128:
        tk = _divisor_tile(K, tk - 128)

    vmem_limit = min(
        max(2 * _prop_vmem_budget(tm, tk, D), 8 << 20) + (8 << 20), 48 << 20
    )

    grid = (M // tm, K // tk)
    kernel = functools.partial(_prop_kernel, scale=float(scale))
    e_out, acc_out = pl.pallas_call(
        kernel,
        out_shape=(
            jax.ShapeDtypeStruct((M, D), jnp.bfloat16),
            jax.ShapeDtypeStruct((M, D), jnp.float32),
        ),
        grid_spec=pltpu.PrefetchScalarGridSpec(
            num_scalar_prefetch=0,
            grid=grid,
            in_specs=[
                pl.BlockSpec((tm, tk), lambda i, k: (i, k)),  # G tile (bf16)
                pl.BlockSpec((tk, D), lambda i, k: (k, 0)),   # E tile (bf16)
                pl.BlockSpec((tm, D), lambda i, k: (i, 0)),   # layer-acc in (f32)
            ],
            out_specs=[
                pl.BlockSpec((tm, D), lambda i, k: (i, 0)),   # E_{l+1} (bf16)
                pl.BlockSpec((tm, D), lambda i, k: (i, 0)),   # layer-acc out (f32)
            ],
            scratch_shapes=[pltpu.VMEM((tm, D), jnp.float32)],
        ),
        compiler_params=pltpu.CompilerParams(
            dimension_semantics=("parallel", "arbitrary"),
            vmem_limit_bytes=int(vmem_limit),
        ),
    )(g_bf16, e_bf16, acc_f32)
    return e_out, acc_out


# ---------------------------------------------------------------------------
# Kernel 2: BPR loss = mean(softplus(neg_score - pos_score))
# Batch tiled over an "arbitrary" grid; partial sums accumulated in a VMEM
# scratch; scalar result written once to an SMEM output.
# ---------------------------------------------------------------------------
def _bpr_kernel(u_ref, p_ref, n_ref, loss_ref, acc_ref, *, batch, tb):
    step = pl.program_id(0)

    @pl.when(step == 0)
    def _():
        acc_ref[...] = jnp.zeros_like(acc_ref)

    u = u_ref[...]
    p = p_ref[...]
    n = n_ref[...]
    pos = jnp.sum(u * p, axis=-1, keepdims=True)   # (tb, 1)
    neg = jnp.sum(u * n, axis=-1, keepdims=True)   # (tb, 1)
    x = neg - pos
    # numerically-stable softplus (matches torch.nn.functional.softplus)
    sp = jnp.maximum(x, 0.0) + jnp.log1p(jnp.exp(-jnp.abs(x)))
    # mask rows beyond the real batch (padding)
    row = jax.lax.broadcasted_iota(jnp.int32, sp.shape, 0) + step * tb
    sp = jnp.where(row < batch, sp, 0.0)
    acc_ref[...] += jnp.sum(sp, keepdims=True)      # (1,1) partial sum

    @pl.when(step == pl.num_programs(0) - 1)
    def _():
        loss_ref[0, 0] = acc_ref[0, 0] * (1.0 / float(batch))


def bpr_loss(u_emb, p_emb, n_emb):
    B, D = u_emb.shape
    tb = min(128, _round_up(B, 8))
    Bp = _round_up(B, tb)
    if Bp != B:
        pad = ((0, Bp - B), (0, 0))
        u_emb = jnp.pad(u_emb, pad)
        p_emb = jnp.pad(p_emb, pad)
        n_emb = jnp.pad(n_emb, pad)
    nb = Bp // tb

    kernel = functools.partial(_bpr_kernel, batch=B, tb=tb)
    out = pl.pallas_call(
        kernel,
        out_shape=jax.ShapeDtypeStruct((1, 1), jnp.float32),
        grid_spec=pltpu.PrefetchScalarGridSpec(
            num_scalar_prefetch=0,
            grid=(nb,),
            in_specs=[pl.BlockSpec((tb, D), lambda i: (i, 0))] * 3,
            out_specs=pl.BlockSpec(memory_space=pltpu.MemorySpace.SMEM),
            scratch_shapes=[pltpu.VMEM((1, 1), jnp.float32)],
        ),
        compiler_params=pltpu.CompilerParams(
            dimension_semantics=("arbitrary",)
        ),
    )(u_emb, p_emb, n_emb)
    return out[0, 0]


# ---------------------------------------------------------------------------
# Whole forward pass, jitted once (propagation layers + gather + BPR loss).
# ---------------------------------------------------------------------------
@functools.partial(
    jax.jit, static_argnames=("num_users", "num_items", "n_layers", "n_pad")
)
def lightgcn_forward(graph_bf16, user_emb, item_emb, users, pos_items, neg_items,
                     *, num_users, num_items, n_layers, n_pad):
    n = num_users + num_items
    all_embeds = jnp.concatenate([user_emb, item_emb], axis=0)
    all_embeds = jnp.pad(all_embeds, ((0, n_pad - n), (0, 0)))
    acc = all_embeds                          # f32 layer-mean accumulator (layer 0)
    e = all_embeds.astype(jnp.bfloat16)       # propagate in bf16
    for layer in range(n_layers):
        scale = 1.0 / float(n_layers + 1) if layer == n_layers - 1 else 1.0
        e, acc = propagate_layer(graph_bf16, e, acc, scale=scale)
    light_out = acc                            # mean already folded into last layer
    all_users = light_out[:num_users]
    all_items = light_out[num_users:n]
    ue = jnp.take(all_users, users, axis=0)
    pe = jnp.take(all_items, pos_items, axis=0)
    ne = jnp.take(all_items, neg_items, axis=0)
    return bpr_loss(ue, pe, ne)


# ---------------------------------------------------------------------------
# LightGCN in JAX, hot paths dispatched to the Pallas kernels above.
# ---------------------------------------------------------------------------
def build_symmetric_graph(num_users, num_items, key):
    """Dense symmetric normalized bipartite adjacency D^-1/2 A D^-1/2 (f32)."""
    n = num_users + num_items
    r = jax.random.uniform(key, (num_users, num_items))
    R = (r < 0.05).astype(jnp.float32)
    A = jnp.zeros((n, n), jnp.float32)
    A = A.at[:num_users, num_users:].set(R)
    A = A.at[num_users:, :num_users].set(R.T)
    deg = jnp.sum(A, axis=1)
    d_inv_sqrt = jnp.where(deg > 0, 1.0 / jnp.sqrt(deg), 0.0)
    return A * d_inv_sqrt[:, None] * d_inv_sqrt[None, :]


class LightGCNPallas:
    def __init__(self, num_users, num_items, embedding_dim, n_layers, key):
        self.num_users = num_users
        self.num_items = num_items
        self.embedding_dim = embedding_dim
        self.n_layers = n_layers
        stdv = 1.0 / math.sqrt(embedding_dim)
        k1, k2, k3 = jax.random.split(key, 3)
        # uniform_(-stdv, stdv) init, deterministic
        self.user_embedding = jax.random.uniform(
            k1, (num_users, embedding_dim), jnp.float32, -stdv, stdv
        )
        self.item_embedding = jax.random.uniform(
            k2, (num_items, embedding_dim), jnp.float32, -stdv, stdv
        )
        self.graph_f32 = build_symmetric_graph(num_users, num_items, k3)

        # pad node dimension to a multiple of 128, store graph once in bf16
        n = num_users + num_items
        self.n_pad = _round_up(n, 128)
        g_pad = jnp.zeros((self.n_pad, self.n_pad), jnp.float32)
        g_pad = g_pad.at[:n, :n].set(self.graph_f32)
        self.graph_bf16 = g_pad.astype(jnp.bfloat16)
        # TODO(synk): dense bf16 stand-in for torch.sparse; a block-sparse
        # scalar-prefetch kernel is needed for realistic (>>10k node) graphs.

    def computer(self):
        # TODO(synk): torch.sparse dropout path (__dropout_x) and adj_split
        # branch not reproduced; this is the eval / dense-graph path.
        n = self.num_users + self.num_items
        all_embeds = jnp.concatenate(
            [self.user_embedding, self.item_embedding], axis=0
        )
        all_embeds = jnp.pad(all_embeds, ((0, self.n_pad - n), (0, 0)))
        acc = all_embeds
        e = all_embeds.astype(jnp.bfloat16)
        for _ in range(self.n_layers):
            e, acc = propagate_layer(self.graph_bf16, e, acc)
        light_out = acc / float(self.n_layers + 1)
        return light_out[: self.num_users], light_out[self.num_users: n]

    def forward(self, users, positive_items, negative_items):
        return lightgcn_forward(
            self.graph_bf16, self.user_embedding, self.item_embedding,
            users, positive_items, negative_items,
            num_users=self.num_users, num_items=self.num_items,
            n_layers=self.n_layers, n_pad=self.n_pad,
        )

    # pure-JAX f32 reference (unpadded, dense) for validation
    def reference_forward(self, users, positive_items, negative_items):
        g = self.graph_f32
        e = jnp.concatenate([self.user_embedding, self.item_embedding], axis=0)
        acc = e
        x = e
        for _ in range(self.n_layers):
            x = g @ x
            acc = acc + x
        light = acc / float(self.n_layers + 1)
        au, ai = light[: self.num_users], light[self.num_users:]
        ue = au[users]
        pe = ai[positive_items]
        ne = ai[negative_items]
        d = jnp.sum(ue * ne, -1) - jnp.sum(ue * pe, -1)
        return jnp.mean(jnp.maximum(d, 0.0) + jnp.log1p(jnp.exp(-jnp.abs(d))))


if __name__ == "__main__":
    num_users, num_items, embedding_dim, n_layers = 128, 128, 128, 3
    key = jax.random.PRNGKey(0)
    k_model, k_u, k_p, k_n = jax.random.split(key, 4)

    model = LightGCNPallas(num_users, num_items, embedding_dim, n_layers, k_model)

    B = 8
    users = jax.random.randint(k_u, (B,), 0, num_users)
    positive_items = jax.random.randint(k_p, (B,), 0, num_items)
    negative_items = jax.random.randint(k_n, (B,), 0, num_items)

    loss = model.forward(users, positive_items, negative_items)
    jax.block_until_ready(loss)

    ref = model.reference_forward(users, positive_items, negative_items)
    jax.block_until_ready(ref)

    assert loss.shape == () and bool(jnp.isfinite(loss))
    # bf16 graph/embeddings vs. f32 reference: loose absolute tolerance
    assert abs(float(loss) - float(ref)) < 5e-2, (float(loss), float(ref))
    print("KERNEL_OK")
</pallas_src>

<mosaic_0001>
module attributes {stable_mosaic.version = 11 : i64} {
  func.func @_prop_kernel(%arg0: i32, %arg1: i32, %arg2: memref<128x256xbf16, #tpu.memory_space<vmem>>, %arg3: memref<256x128xbf16, #tpu.memory_space<vmem>>, %arg4: memref<128x128xf32, #tpu.memory_space<vmem>>, %arg5: memref<128x128xbf16, #tpu.memory_space<vmem>>, %arg6: memref<128x128xf32, #tpu.memory_space<vmem>>, %arg7: memref<128x128xf32, #tpu.memory_space<vmem>>) attributes {dimension_semantics = [#tpu.dimension_semantics<parallel>, #tpu.dimension_semantics<arbitrary>], iteration_bounds = array<i64: 2, 1>, scalar_prefetch = 0 : i64, scratch_operands = 1 : i64, tpu.core_type = #tpu.core_type<tc>, window_params = [{transform_indices = @transform_0, window_bounds = array<i64: 128, 256>}, {transform_indices = @transform_1, window_bounds = array<i64: 256, 128>}, {transform_indices = @transform_2, window_bounds = array<i64: 128, 128>}, {transform_indices = @transform_3, window_bounds = array<i64: 128, 128>}, {transform_indices = @transform_4, window_bounds = array<i64: 128, 128>}]} {
    %c0_i32 = arith.constant 0 : i32
    %0 = arith.cmpi eq, %arg1, %c0_i32 : i32
    %1 = arith.extui %0 : i1 to i32
    %c0_i32_0 = arith.constant 0 : i32
    %2 = arith.cmpi ne, %1, %c0_i32_0 : i32
    scf.if %2 {
      %cst_10 = arith.constant 0.000000e+00 : f32
      %12 = vector.broadcast %cst_10 : f32 to vector<128x128xf32>
      %c0_11 = arith.constant 0 : index
      %c0_12 = arith.constant 0 : index
      %13 = vector.load %arg7[%c0_11, %c0_12] : memref<128x128xf32, #tpu.memory_space<vmem>>, vector<128x128xf32>
      tpu.vector_store %arg7[%c0_11, %c0_12], %12 {strides = array<i32>} : memref<128x128xf32, #tpu.memory_space<vmem>>, vector<128x128xf32>,
    } else {
    }
    %c0 = arith.constant 0 : index
    %c0_1 = arith.constant 0 : index
    %3 = vector.load %arg7[%c0, %c0_1] : memref<128x128xf32, #tpu.memory_space<vmem>>, vector<128x128xf32>
    %c0_2 = arith.constant 0 : index
    %c0_3 = arith.constant 0 : index
    %4 = vector.load %arg2[%c0_2, %c0_3] : memref<128x256xbf16, #tpu.memory_space<vmem>>, vector<128x256xbf16>
    %c0_4 = arith.constant 0 : index
    %c0_5 = arith.constant 0 : index
    %5 = vector.load %arg3[%c0_4, %c0_5] : memref<256x128xbf16, #tpu.memory_space<vmem>>, vector<256x128xbf16>
    %cst = arith.constant dense<0.000000e+00> : vector<128x128xf32>
    %6 = tpu.matmul %4, %5, %cst {dimension_numbers = #tpu.dot_dimension_numbers<[1], [0], [0], [1], [0, 0, 1, 1], [], []>} : vector<128x256xbf16>, vector<256x128xbf16>, vector<128x128xf32> -> vector<128x128xf32>
    %7 = arith.addf %3, %6 : vector<128x128xf32>
    %c0_6 = arith.constant 0 : index
    %c0_7 = arith.constant 0 : index
    %8 = vector.load %arg7[%c0_6, %c0_7] : memref<128x128xf32, #tpu.memory_space<vmem>>, vector<128x128xf32>
    tpu.vector_store %arg7[%c0_6, %c0_7], %7 {strides = array<i32>} : memref<128x128xf32, #tpu.memory_space<vmem>>, vector<128x128xf32>,
    %c0_i32_8 = arith.constant 0 : i32
    %9 = arith.cmpi eq, %arg1, %c0_i32_8 : i32
    %10 = arith.extui %9 : i1 to i32
    %c0_i32_9 = arith.constant 0 : i32
    %11 = arith.cmpi ne, %10, %c0_i32_9 : i32
    scf.if %11 {
      %c0_10 = arith.constant 0 : index
      %c0_11 = arith.constant 0 : index
      %12 = vector.load %arg7[%c0_10, %c0_11] : memref<128x128xf32, #tpu.memory_space<vmem>>, vector<128x128xf32>
      %13 = arith.truncf %12 : vector<128x128xf32> to vector<128x128xbf16>
      %c0_12 = arith.constant 0 : index
      %c0_13 = arith.constant 0 : index
      %14 = vector.load %arg5[%c0_12, %c0_13] : memref<128x128xbf16, #tpu.memory_space<vmem>>, vector<128x128xbf16>
      tpu.vector_store %arg5[%c0_12, %c0_13], %13 {strides = array<i32>} : memref<128x128xbf16, #tpu.memory_space<vmem>>, vector<128x128xbf16>,
      %c0_14 = arith.constant 0 : index
      %c0_15 = arith.constant 0 : index
      %15 = vector.load %arg4[%c0_14, %c0_15] : memref<128x128xf32, #tpu.memory_space<vmem>>, vector<128x128xf32>
      %16 = arith.addf %15, %12 : vector<128x128xf32>
      %c0_16 = arith.constant 0 : index
      %c0_17 = arith.constant 0 : index
      %17 = vector.load %arg6[%c0_16, %c0_17] : memref<128x128xf32, #tpu.memory_space<vmem>>, vector<128x128xf32>
      tpu.vector_store %arg6[%c0_16, %c0_17], %16 {strides = array<i32>} : memref<128x128xf32, #tpu.memory_space<vmem>>, vector<128x128xf32>,
    } else {
    }
    return
  }
  func.func @transform_0(%arg0: i32, %arg1: i32) -> (i32, i32) {
    %c0_i32 = arith.constant 0 : i32
    return %arg0, %arg1 : i32, i32
  }
  func.func @transform_1(%arg0: i32, %arg1: i32) -> (i32, i32) {
    %c0_i32 = arith.constant 0 : i32
    %c0_i32_0 = arith.constant 0 : i32
    return %arg1, %c0_i32 : i32, i32
  }
  func.func @transform_2(%arg0: i32, %arg1: i32) -> (i32, i32) {
    %c0_i32 = arith.constant 0 : i32
    %c0_i32_0 = arith.constant 0 : i32
    return %arg0, %c0_i32 : i32, i32
  }
  func.func @transform_3(%arg0: i32, %arg1: i32) -> (i32, i32) {
    %c0_i32 = arith.constant 0 : i32
    %c0_i32_0 = arith.constant 0 : i32
    return %arg0, %c0_i32 : i32, i32
  }
  func.func @transform_4(%arg0: i32, %arg1: i32) -> (i32, i32) {
    %c0_i32 = arith.constant 0 : i32
    %c0_i32_0 = arith.constant 0 : i32
    return %arg0, %c0_i32 : i32, i32
  }
}

module attributes {stable_mosaic.version = 11 : i64} {
  func.func @_prop_kernel(%arg0: i32, %arg1: i32, %arg2: memref<128x256xbf16, #tpu.memory_space<vmem>>, %arg3: memref<256x128xbf16, #tpu.memory_space<vmem>>, %arg4: memref<128x128xf32, #tpu.memory_space<vmem>>, %arg5: memref<128x128xbf16, #tpu.memory_space<vmem>>, %arg6: memref<128x128xf32, #tpu.memory_space<vmem>>, %arg7: memref<128x128xf32, #tpu.memory_space<vmem>>) attributes {dimension_semantics = [#tpu.dimension_semantics<parallel>, #tpu.dimension_semantics<arbitrary>], iteration_bounds = array<i64: 2, 1>, scalar_prefetch = 0 : i64, scratch_operands = 1 : i64, tpu.core_type = #tpu.core_type<tc>, window_params = [{transform_indices = @transform_0, window_bounds = array<i64: 128, 256>}, {transform_indices = @transform_1, window_bounds = array<i64: 256, 128>}, {transform_indices = @transform_2, window_bounds = array<i64: 128, 128>}, {transform_indices = @transform_3, window_bounds = array<i64: 128, 128>}, {transform_indices = @transform_4, window_bounds = array<i64: 128, 128>}]} {
    %c0_i32 = arith.constant 0 : i32
    %0 = arith.cmpi eq, %arg1, %c0_i32 : i32
    %1 = arith.extui %0 : i1 to i32
    %c0_i32_0 = arith.constant 0 : i32
    %2 = arith.cmpi ne, %1, %c0_i32_0 : i32
    scf.if %2 {
      %cst_10 = arith.constant 0.000000e+00 : f32
      %12 = vector.broadcast %cst_10 : f32 to vector<128x128xf32>
      %c0_11 = arith.constant 0 : index
      %c0_12 = arith.constant 0 : index
      %13 = vector.load %arg7[%c0_11, %c0_12] : memref<128x128xf32, #tpu.memory_space<vmem>>, vector<128x128xf32>
      tpu.vector_store %arg7[%c0_11, %c0_12], %12 {strides = array<i32>} : memref<128x128xf32, #tpu.memory_space<vmem>>, vector<128x128xf32>,
    } else {
    }
    %c0 = arith.constant 0 : index
    %c0_1 = arith.constant 0 : index
    %3 = vector.load %arg7[%c0, %c0_1] : memref<128x128xf32, #tpu.memory_space<vmem>>, vector<128x128xf32>
    %c0_2 = arith.constant 0 : index
    %c0_3 = arith.constant 0 : index
    %4 = vector.load %arg2[%c0_2, %c0_3] : memref<128x256xbf16, #tpu.memory_space<vmem>>, vector<128x256xbf16>
    %c0_4 = arith.constant 0 : index
    %c0_5 = arith.constant 0 : index
    %5 = vector.load %arg3[%c0_4, %c0_5] : memref<256x128xbf16, #tpu.memory_space<vmem>>, vector<256x128xbf16>
    %cst = arith.constant dense<0.000000e+00> : vector<128x128xf32>
    %6 = tpu.matmul %4, %5, %cst {dimension_numbers = #tpu.dot_dimension_numbers<[1], [0], [0], [1], [0, 0, 1, 1], [], []>} : vector<128x256xbf16>, vector<256x128xbf16>, vector<128x128xf32> -> vector<128x128xf32>
    %7 = arith.addf %3, %6 : vector<128x128xf32>
    %c0_6 = arith.constant 0 : index
    %c0_7 = arith.constant 0 : index
    %8 = vector.load %arg7[%c0_6, %c0_7] : memref<128x128xf32, #tpu.memory_space<vmem>>, vector<128x128xf32>
    tpu.vector_store %arg7[%c0_6, %c0_7], %7 {strides = array<i32>} : memref<128x128xf32, #tpu.memory_space<vmem>>, vector<128x128xf32>,
    %c0_i32_8 = arith.constant 0 : i32
    %9 = arith.cmpi eq, %arg1, %c0_i32_8 : i32
    %10 = arith.extui %9 : i1 to i32
    %c0_i32_9 = arith.constant 0 : i32
    %11 = arith.cmpi ne, %10, %c0_i32_9 : i32
    scf.if %11 {
      %c0_10 = arith.constant 0 : index
      %c0_11 = arith.constant 0 : index
      %12 = vector.load %arg7[%c0_10, %c0_11] : memref<128x128xf32, #tpu.memory_space<vmem>>, vector<128x128xf32>
      %13 = arith.truncf %12 : vector<128x128xf32> to vector<128x128xbf16>
      %c0_12 = arith.constant 0 : index
      %c0_13 = arith.constant 0 : index
      %14 = vector.load %arg5[%c0_12, %c0_13] : memref<128x128xbf16, #tpu.memory_space<vmem>>, vector<128x128xbf16>
      tpu.vector_store %arg5[%c0_12, %c0_13], %13 {strides = array<i32>} : memref<128x128xbf16, #tpu.memory_space<vmem>>, vector<128x128xbf16>,
      %c0_14 = arith.constant 0 : index
      %c0_15 = arith.constant 0 : index
      %15 = vector.load %arg4[%c0_14, %c0_15] : memref<128x128xf32, #tpu.memory_space<vmem>>, vector<128x128xf32>
      %16 = arith.addf %15, %12 : vector<128x128xf32>
      %cst_16 = arith.constant 2.500000e-01 : f32
      %17 = vector.broadcast %cst_16 : f32 to vector<128x128xf32>
      %18 = arith.mulf %16, %17 : vector<128x128xf32>
      %c0_17 = arith.constant 0 : index
      %c0_18 = arith.constant 0 : index
      %19 = vector.load %arg6[%c0_17, %c0_18] : memref<128x128xf32, #tpu.memory_space<vmem>>, vector<128x128xf32>
      tpu.vector_store %arg6[%c0_17, %c0_18], %18 {strides = array<i32>} : memref<128x128xf32, #tpu.memory_space<vmem>>, vector<128x128xf32>,
    } else {
    }
    return
  }
  func.func @transform_0(%arg0: i32, %arg1: i32) -> (i32, i32) {
    %c0_i32 = arith.constant 0 : i32
    return %arg0, %arg1 : i32, i32
  }
  func.func @transform_1(%arg0: i32, %arg1: i32) -> (i32, i32) {
    %c0_i32 = arith.constant 0 : i32
    %c0_i32_0 = arith.constant 0 : i32
    return %arg1, %c0_i32 : i32, i32
  }
  func.func @transform_2(%arg0: i32, %arg1: i32) -> (i32, i32) {
    %c0_i32 = arith.constant 0 : i32
    %c0_i32_0 = arith.constant 0 : i32
    return %arg0, %c0_i32 : i32, i32
  }
  func.func @transform_3(%arg0: i32, %arg1: i32) -> (i32, i32) {
    %c0_i32 = arith.constant 0 : i32
    %c0_i32_0 = arith.constant 0 : i32
    return %arg0, %c0_i32 : i32, i32
  }
  func.func @transform_4(%arg0: i32, %arg1: i32) -> (i32, i32) {
    %c0_i32 = arith.constant 0 : i32
    %c0_i32_0 = arith.constant 0 : i32
    return %arg0, %c0_i32 : i32, i32
  }
}

module attributes {stable_mosaic.version = 11 : i64} {
  func.func @_bpr_kernel(%arg0: i32, %arg1: memref<8x128xf32, #tpu.memory_space<vmem>>, %arg2: memref<8x128xf32, #tpu.memory_space<vmem>>, %arg3: memref<8x128xf32, #tpu.memory_space<vmem>>, %arg4: memref<1x1xf32, #tpu.memory_space<smem>>, %arg5: memref<1x1xf32, #tpu.memory_space<vmem>>) attributes {dimension_semantics = [#tpu.dimension_semantics<arbitrary>], iteration_bounds = array<i64: 1>, scalar_prefetch = 0 : i64, scratch_operands = 1 : i64, tpu.core_type = #tpu.core_type<tc>, window_params = [{transform_indices = @transform_0, window_bounds = array<i64: 8, 128>}, {transform_indices = @transform_1, window_bounds = array<i64: 8, 128>}, {transform_indices = @transform_2, window_bounds = array<i64: 8, 128>}, {transform_indices = @transform_3, window_bounds = array<i64: 1, 1>}]} {
    %c0_i32 = arith.constant 0 : i32
    %0 = arith.cmpi eq, %arg0, %c0_i32 : i32
    %1 = arith.extui %0 : i1 to i32
    %c0_i32_0 = arith.constant 0 : i32
    %2 = arith.cmpi ne, %1, %c0_i32_0 : i32
    scf.if %2 {
      %cst_18 = arith.constant 0.000000e+00 : f32
      %40 = vector.broadcast %cst_18 : f32 to vector<1x1xf32>
      %c0_19 = arith.constant 0 : index
      %c0_20 = arith.constant 0 : index
      %41 = vector.load %arg5[%c0_19, %c0_20] : memref<1x1xf32, #tpu.memory_space<vmem>>, vector<1x1xf32>
      tpu.vector_store %arg5[%c0_19, %c0_20], %40 {strides = array<i32>} : memref<1x1xf32, #tpu.memory_space<vmem>>, vector<1x1xf32>,
    } else {
    }
    %c0 = arith.constant 0 : index
    %c0_1 = arith.constant 0 : index
    %3 = vector.load %arg1[%c0, %c0_1] : memref<8x128xf32, #tpu.memory_space<vmem>>, vector<8x128xf32>
    %c0_2 = arith.constant 0 : index
    %c0_3 = arith.constant 0 : index
    %4 = vector.load %arg2[%c0_2, %c0_3] : memref<8x128xf32, #tpu.memory_space<vmem>>, vector<8x128xf32>
    %c0_4 = arith.constant 0 : index
    %c0_5 = arith.constant 0 : index
    %5 = vector.load %arg3[%c0_4, %c0_5] : memref<8x128xf32, #tpu.memory_space<vmem>>, vector<8x128xf32>
    %6 = arith.mulf %3, %4 : vector<8x128xf32>
    %cst = arith.constant dense<0.000000e+00> : vector<8xf32>
    %7 = vector.multi_reduction <add>, %6, %cst [1] : vector<8x128xf32> to vector<8xf32>
    %8 = vector.shape_cast %7 : vector<8xf32> to vector<8x1xf32>
    %9 = arith.mulf %3, %5 : vector<8x128xf32>
    %cst_6 = arith.constant dense<0.000000e+00> : vector<8xf32>
    %10 = vector.multi_reduction <add>, %9, %cst_6 [1] : vector<8x128xf32> to vector<8xf32>
    %11 = vector.shape_cast %10 : vector<8xf32> to vector<8x1xf32>
    %12 = arith.subf %11, %8 : vector<8x1xf32>
    %cst_7 = arith.constant 0.000000e+00 : f32
    %13 = vector.broadcast %cst_7 : f32 to vector<8x1xf32>
    %14 = arith.maximumf %12, %13 : vector<8x1xf32>
    %15 = math.absf %12 : vector<8x1xf32>
    %cst_8 = arith.constant 0.000000e+00 : f32
    %16 = vector.broadcast %cst_8 : f32 to vector<8x1xf32>
    %17 = arith.subf %16, %15 : vector<8x1xf32>
    %18 = math.exp %17 : vector<8x1xf32>
    %19 = math.log1p %18 : vector<8x1xf32>
    %20 = arith.addf %14, %19 : vector<8x1xf32>
    %21 = tpu.iota {dimensions = array<i32: 0>} : vector<8x1xi32>
    %c8_i32 = arith.constant 8 : i32
    %22 = arith.muli %arg0, %c8_i32 : i32
    %23 = vector.broadcast %22 : i32 to vector<8x1xi32>
    %24 = arith.addi %21, %23 : vector<8x1xi32>
    %c8_i32_9 = arith.constant 8 : i32
    %25 = vector.broadcast %c8_i32_9 : i32 to vector<8x1xi32>
    %26 = arith.cmpi slt, %24, %25 : vector<8x1xi32>
    %cst_10 = arith.constant 0.000000e+00 : f32
    %27 = vector.broadcast %cst_10 : f32 to vector<8x1xf32>
    %28 = arith.select %26, %20, %27 : vector<8x1xi1>, vector<8x1xf32>
    %c0_11 = arith.constant 0 : index
    %c0_12 = arith.constant 0 : index
    %29 = vector.load %arg5[%c0_11, %c0_12] : memref<1x1xf32, #tpu.memory_space<vmem>>, vector<1x1xf32>
    %30 = vector.shape_cast %28 : vector<8x1xf32> to vector<1x8x1xf32>
    %cst_13 = arith.constant dense<0.000000e+00> : vector<1xf32>
    %31 = vector.multi_reduction <add>, %30, %cst_13 [1, 2] : vector<1x8x1xf32> to vector<1xf32>
    %32 = vector.shape_cast %31 : vector<1xf32> to vector<1x1x1xf32>
    %33 = vector.extract %32[0, 0, 0] : f32 from vector<1x1x1xf32>
    %34 = vector.broadcast %33 : f32 to vector<1x1xf32>
    %35 = arith.addf %29, %34 : vector<1x1xf32>
    %c0_14 = arith.constant 0 : index
    %c0_15 = arith.constant 0 : index
    %36 = vector.load %arg5[%c0_14, %c0_15] : memref<1x1xf32, #tpu.memory_space<vmem>>, vector<1x1xf32>
    tpu.vector_store %arg5[%c0_14, %c0_15], %35 {strides = array<i32>} : memref<1x1xf32, #tpu.memory_space<vmem>>, vector<1x1xf32>,
    %c0_i32_16 = arith.constant 0 : i32
    %37 = arith.cmpi eq, %arg0, %c0_i32_16 : i32
    %38 = arith.extui %37 : i1 to i32
    %c0_i32_17 = arith.constant 0 : i32
    %39 = arith.cmpi ne, %38, %c0_i32_17 : i32
    scf.if %39 {
      %c0_18 = arith.constant 0 : index
      %c0_19 = arith.constant 0 : index
      %40 = vector.load %arg5[%c0_18, %c0_19] : memref<1x1xf32, #tpu.memory_space<vmem>>, vector<1x1xf32>
      %41 = vector.extract %40[0, 0] : f32 from vector<1x1xf32>
      %cst_20 = arith.constant 1.250000e-01 : f32
      %42 = arith.mulf %41, %cst_20 : f32
      %c0_21 = arith.constant 0 : index
      %c0_22 = arith.constant 0 : index
      %43 = memref.load %arg4[%c0_21, %c0_22] : memref<1x1xf32, #tpu.memory_space<smem>>
      memref.store %42, %arg4[%c0_21, %c0_22] : memref<1x1xf32, #tpu.memory_space<smem>>
    } else {
    }
    return
  }
  func.func @transform_0(%arg0: i32) -> (i32, i32) {
    %c0_i32 = arith.constant 0 : i32
    %c0_i32_0 = arith.constant 0 : i32
    return %arg0, %c0_i32 : i32, i32
  }
  func.func @transform_1(%arg0: i32) -> (i32, i32) {
    %c0_i32 = arith.constant 0 : i32
    %c0_i32_0 = arith.constant 0 : i32
    return %arg0, %c0_i32 : i32, i32
  }
  func.func @transform_2(%arg0: i32) -> (i32, i32) {
    %c0_i32 = arith.constant 0 : i32
    %c0_i32_0 = arith.constant 0 : i32
    return %arg0, %c0_i32 : i32, i32
  }
  func.func @transform_3(%arg0: i32) -> (i32, i32) {
    %c0_i32 = arith.constant 0 : i32
    %c0_i32_0 = arith.constant 0 : i32
    %c0_i32_1 = arith.constant 0 : i32
    return %c0_i32, %c0_i32_0 : i32, i32
  }
}

</mosaic_0001>

<bundles_post_ra>
// kernel: lightgcn_forward.7
= control target key start
LH: loop header
LB: loop body
LE: loop exit
PB: predicated region body
PF: predicated region fallthrough
CT: control target
= control target key end

     0   :  { %s155_s0 = inlined_call_operand.vmem [shape: f32[8,128], index: 0, kind: input, shape index: {}]   ;;  %s156_s1 = inlined_call_operand.vmem [shape: f32[8,128], index: 1, kind: input, shape index: {}]   ;;  %s157_s2 = inlined_call_operand.vmem [shape: f32[8,128], index: 2, kind: input, shape index: {}]   ;;  %s158_s3 = inlined_call_operand.hbm [shape: f32[1,1], index: 3, kind: output, shape index: {}]  }
   0x1   :  { %v21_v0 = vld [vmem:[%s155_s0] sm:$0xff] }
   0x2   :  { %v22_v1 = vld [vmem:[%s156_s1] sm:$0xff] }
   0x3   :  { %v23_v2 = vld [vmem:[%s157_s2] sm:$0xff]  ;;  %v24_v3 = vmul.f32 %v22_v1, %v21_v0 }
   0x4   :  { %8 = vsyncpa [#allocation4], 0  ;;  %v27_v4 = vmul.f32 %v23_v2, %v21_v0  ;;  %vm54_vm1 = vcmask 7168   ;;  %vm19_vm2 = vcmask 0   ;;  %v112_v23 = vmov 0.0   ;;  %s100_s20 = scalar_lea.hbm %s158_s3, 16 }
   0x5   :  { %25 = vadd.xlane.f32.xlu0 %v24_v3  ;;  %20 = vst.msk [vmem:[#allocation2] sm:$0x1] %vm19_vm2, %v112_v23  ;;  %p101_p0 = scmp.ne.s32.totalorder %s158_s3, %s100_s20  ;;  %p104_p1 = scmp.lt.u32.totalorder %s100_s20, %s158_s3 }
   0x7   :  { %p106_p2 = pnand %p104_p1, %p101_p0 }
   0x9   :  { %28 = vadd.xlane.f32.xlu0 %v27_v4 }
   0xc   :  { %v53_v31 = vld [vmem:[#allocation2] sm:$0x1] }
  0x92   :  { %v26_v5 = vpop.xlane.xlu0 %25 }
  0x96   :  { %v29_v6 = vpop.xlane.xlu0 %28 }
  0x97   :  { %v30_v7 = vsub.f32 %v29_v6, %v26_v5 }
  0x99   :  { %v32_v8 = vand.u32 2147483647, %v30_v7  ;;  %v31_v19 = vmax.f32 %v30_v7, 0.0 }
  0x9b   :  { %v33_v9 = vsub.f32 0.0, %v32_v8 }
  0x9d   :  { %v34_v10 = vmul.f32 1.442695, %v33_v9 }
  0x9f   :  { %96 = vpow2.f32 %v34_v10 }
  0xa9   :  { %v97_v11 = vpop.eup %96 }
  0xaa   :  { %v36_v12 = vadd.f32 1.0, %v97_v11  ;;  %v39_v13 = vmul.f32 -0.5, %v97_v11  ;;  %v42_v15 = vand.u32 2147483647, %v97_v11 }
  0xac   :  { %98 = vlog2.f32 %v36_v12  ;;  %v40_v14 = vadd.f32 1.0, %v39_v13  ;;  %vm43_vm0 = vcmp.lt.f32.partialorder %v42_v15, 0.0004427343 }
  0xae   :  { %v41_v18 = vmul.f32 %v97_v11, %v40_v14 }
  0xb6   :  { %v99_v16 = vpop.eup %98 }
  0xb7   :  { %v38_v17 = vmul.f32 0.6931472, %v99_v16 }
  0xb9   :  { %v44_v20 = vsel %vm43_vm0, %v41_v18, %v38_v17 }
  0xba   :  { %v45_v21 = vadd.f32 %v44_v20, %v31_v19 }
  0xbc   :  { %v55_v22 = vsel %vm54_vm1, %v45_v21, 0.0 }
  0xbd   :  { %56 = vadd.xlane.f32.xlu1 %v55_v22 }
 0x14a   :  { %v57_v24 = vpop.xlane.xlu1 %56 }
 0x14b   :  { %v58_v25 = vrot.slane %v57_v24, 4 }
 0x14d   :  { %v59_v26 = vadd.f32 %v58_v25, %v57_v24 }
 0x14f   :  { %v60_v27 = vrot.slane %v59_v26, 2 }
 0x151   :  { %v61_v28 = vadd.f32 %v60_v27, %v59_v26 }
 0x153   :  { %v62_v29 = vrot.slane %v61_v28, 1 }
 0x155   :  { %v63_v30 = vadd.f32 %v62_v29, %v61_v28 }
 0x157   :  { %90 = vpush %v63_v30 }
 0x188   :  { %s91_s0 = spop %90 }
 0x189   :  { %v65_v32 = vstv %s91_s0 }
 0x18a   :  { %v66_v33 = vadd.f32 %v65_v32, %v53_v31 }
 0x18c   :  { %68 = vst.msk [vmem:[#allocation2] sm:$0x1] %vm19_vm2, %v66_v33 }
 0x193   :  { %v72_v34 = vld [vmem:[#allocation2] sm:$0x1] }
 0x194   :  { %92 = vpush %v72_v34 }
 0x1c5   :  { %s93_s1 = spop %92 }
 0x1c6   :  { %s74_s2 = smul.f32 0.125, %s93_s1 }
 0x1c8   :  { %76 = sst [smem:[#allocation3]] %s74_s2 }
 0x1c9   :  { %109 = shalt.err (!%p106_p2)
}
 0x1ca   :  { %s113_s25 = smov [#allocation3]  }
 0x1cb   :  { %84 = dma.smem_to_hbm %s113_s25, 16, %s158_s3, [#allocation4]  }
 0x1cc   :  { %110 = dma.done.wait [#allocation4], 16  }
 0x1cd   :  { %111 = vsyncadd [#allocation4], 4294967280 }
 0x1ce   :  { %88 = sfence }
 0x1cf   :  { %89 = vsyncpa [#allocation4], 1 }

// kernel: lightgcn_forward.4
= control target key start
LH: loop header
LB: loop body
LE: loop exit
PB: predicated region body
PF: predicated region fallthrough
CT: control target
= control target key end

     0   :  { %s1281_s15 = smov 0   ;;  %s1283_s16 = smov 0   ;;  %s1441_s0 = inlined_call_operand.vmem [shape: bf16[256,256], index: 0, kind: input, shape index: {}]   ;;  %s1442_s1 = inlined_call_operand.vmem [shape: bf16[256,128], index: 1, kind: input, shape index: {}]   ;;  %s1443_s2 = inlined_call_operand.vmem [shape: f32[256,128], index: 2, kind: input, shape index: {}]   ;;  %s1444_s3 = inlined_call_operand.vmem [shape: bf16[256,128], index: 3, kind: output, shape index: {0}]   ;;  %s1445_s4 = inlined_call_operand.vmem [shape: f32[256,128], index: 4, kind: output, shape index: {1}]  }
   0x1   :  { %s1285_s17 = smov 0  }
   0x2 LB: > { %s27_s18 = sadd.s32 1, %s1250_s16  ;;  %p964_p0 = scmp.ge.s32.totalorder %s1254_s17, 1  ;;  %s1254_s17 = sphi %s1285_s17, %s15_s17   ;;  %s1250_s16 = sphi %s1283_s16, %s1447_s16   ;;  %s1246_s15 = sphi %s1281_s15, %s1446_s15  }
   0x3   : > { %p29_p1 = scmp.ge.s32.totalorder %s27_s18, 2  ;;  %p208_p2 = scmp.lt.s32.totalorder %s1254_s17, 3 }
   0x5   : > { %s1449_s18 = smov (%p29_p1, %s27_s18), 0  ;;  %p209_p3 = pnand %p964_p0, %p208_p2 }
   0x6   : > { %v1192_v0 = vld [vmem:[%s1442_s1 + $0x40] sm:$0xff] (!%p209_p3)   ;;  %s965_s21 = sshll.u32 (!%p209_p3), %s1246_s15, 4  ;;  %v1194_v2 = vld [vmem:[%s1442_s1 + $0x48] sm:$0xff] (!%p209_p3)   ;;  %v1196_v4 = vld [vmem:[%s1442_s1 + $0x50] sm:$0xff] (!%p209_p3)  }
   0x7   : > { %212 = sbr.rel (%p209_p3) target bundleno = 284 (0x11c), region = 32  ;;  %v1193_v1 = vld [vmem:[%s1442_s1] sm:$0xff] (!%p209_p3)   ;;  %1088 = vmatprep.subr.bf16.mxu0 (!%p209_p3), %v1192_v0  ;;  %1152 = vmatprep.subr.bf16.mxu1 (!%p209_p3), %v1192_v0  ;;  %v1195_v3 = vld [vmem:[%s1442_s1 + $0x8] sm:$0xff] (!%p209_p3)   ;;  %p256_p4 = scmp.lt.s32.totalorder (!%p209_p3), %s965_s21, 31  ;;  %v1197_v5 = vld [vmem:[%s1442_s1 + $0x10] sm:$0xff] (!%p209_p3)  }
   0x8   : > { %1089 = vmatpush3.bf16.msra.mxu0 (!%p209_p3), %v1193_v1  ;;  %1160 = vmatpush3.bf16.msra.mxu1 (!%p209_p3), %v1193_v1  ;;  %v1198_v6 = vld [vmem:[%s1442_s1 + $0x58] sm:$0xff] (!%p209_p3)   ;;  %v1200_v8 = vld [vmem:[%s1442_s1 + $0x60] sm:$0xff] (!%p209_p3)   ;;  %v1202_v10 = vld [vmem:[%s1442_s1 + $0x68] sm:$0xff] (!%p209_p3)  }
   0x9   : > { %1090 = vmatprep.subr.bf16.mxu0 (!%p209_p3), %v1194_v2  ;;  %1153 = vmatprep.subr.bf16.mxu1 (!%p209_p3), %v1194_v2  ;;  %v1199_v7 = vld [vmem:[%s1442_s1 + $0x18] sm:$0xff] (!%p209_p3)   ;;  %v1201_v9 = vld [vmem:[%s1442_s1 + $0x20] sm:$0xff] (!%p209_p3)   ;;  %v1203_v13 = vld [vmem:[%s1442_s1 + $0x28] sm:$0xff] (!%p209_p3)  }
   0xa   : > { %v1204_v14 = vld [vmem:[%s1442_s1 + $0x70] sm:$0xff] (!%p209_p3)   ;;  %v1206_v16 = vld [vmem:[%s1442_s1 + $0x78] sm:$0xff] (!%p209_p3)  }
   0xb   : > { %v1205_v15 = vld [vmem:[%s1442_s1 + $0x30] sm:$0xff] (!%p209_p3)   ;;  %v1207_v17 = vld [vmem:[%s1442_s1 + $0x38] sm:$0xff] (!%p209_p3)  }
   0xc   : > { %1091 = vmatpush3.bf16.msra.mxu0 (!%p209_p3), %v1195_v3  ;;  %1161 = vmatpush3.bf16.msra.mxu1 (!%p209_p3), %v1195_v3 }
   0xd   : > { %1092 = vmatprep.subr.bf16.mxu0 (!%p209_p3), %v1196_v4  ;;  %1154 = vmatprep.subr.bf16.mxu1 (!%p209_p3), %v1196_v4 }
   0xe   : > { %s1451_s21 = smov (!%p256_p4, %s965_s21), 31 }
   0xf   : > { %s1326_s10 = sshll.u32 %s1451_s21, 3  ;;  %s971_s12 = sshll.u32 %s1451_s21, 2 }
  0x10   : > { %1093 = vmatpush3.bf16.msra.mxu0 %v1197_v5  ;;  %1162 = vmatpush3.bf16.msra.mxu1 %v1197_v5  ;;  %s1335_s15 = scalar_lea.vmem %s1441_s0, %s1326_s10  ;;  %s1378_s11 = scalar_lea.vmem %s1443_s2, %s1326_s10 }
  0x11   : > { %1094 = vmatprep.subr.bf16.mxu0 %v1198_v6  ;;  %1155 = vmatprep.subr.bf16.mxu1 %v1198_v6  ;;  %v1210_v11 = vld [vmem:[%s1335_s15 + $0x4] ss:$8 sps:$4 sm:$0xff]   ;;  %v1208_v18 = vld [vmem:[%s1335_s15] ss:$8 sps:$4 sm:$0xff]   ;;  %v1214_v20 = vld [vmem:[%s1335_s15 + $0x14] ss:$8 sps:$4 sm:$0xff]   ;;  %s1394_s20 = scalar_lea.vmem %s1444_s3, %s971_s12 }
  0x12   : > { %v1213_v12 = vld [vmem:[%s1335_s15 + $0x44] ss:$8 sps:$4 sm:$0xff]   ;;  %583 = vmatprep.mubr.bf16.mxu0 %v1210_v11  ;;  %v1211_v19 = vld [vmem:[%s1335_s15 + $0x40] ss:$8 sps:$4 sm:$0xff]   ;;  %v1216_v21 = vld [vmem:[%s1335_s15 + $0x54] ss:$8 sps:$4 sm:$0xff]  }
  0x13   : > { %615 = vmatprep.mubr.bf16.mxu1 %v1213_v12  ;;  %v1218_v22 = vld [vmem:[%s1335_s15 + $0x10] ss:$8 sps:$4 sm:$0xff]   ;;  %v1220_v24 = vld [vmem:[%s1335_s15 + $0x24] ss:$8 sps:$4 sm:$0xff]   ;;  %v1224_v26 = vld [vmem:[%s1335_s15 + $0x20] ss:$8 sps:$4 sm:$0xff]  }
  0x14   : > { %1095 = vmatpush3.bf16.msra.mxu0 %v1199_v7  ;;  %1163 = vmatpush3.bf16.msra.mxu1 %v1199_v7  ;;  %v1219_v23 = vld [vmem:[%s1335_s15 + $0x50] ss:$8 sps:$4 sm:$0xff]   ;;  %v1222_v25 = vld [vmem:[%s1335_s15 + $0x64] ss:$8 sps:$4 sm:$0xff]   ;;  %v1225_v27 = vld [vmem:[%s1335_s15 + $0x60] ss:$8 sps:$4 sm:$0xff]  }
  0x15   : > { %1096 = vmatprep.subr.bf16.mxu0 %v1200_v8  ;;  %1156 = vmatprep.subr.bf16.mxu1 %v1200_v8  ;;  %v1226_v28 = vld [vmem:[%s1335_s15 + $0x34] ss:$8 sps:$4 sm:$0xff]   ;;  %v1230_v30 = vld [vmem:[%s1335_s15 + $0x30] ss:$8 sps:$4 sm:$0xff]   ;;  %v779_v35 = vld [vmem:[%s1378_s11] sm:$0xff] }
  0x16   : > { %v1228_v29 = vld [vmem:[%s1335_s15 + $0x74] ss:$8 sps:$4 sm:$0xff]   ;;  %v1231_v31 = vld [vmem:[%s1335_s15 + $0x70] ss:$8 sps:$4 sm:$0xff]   ;;  %v787_v37 = vld [vmem:[%s1378_s11 + $0x40] sm:$0xff]  ;;  %s1387_s15 = scalar_lea.vmem %s1445_s4, %s1326_s10 }
  0x17   : > { %v780_v43 = vld [vmem:[%s1378_s11 + $0x8] sm:$0xff]  ;;  %v781_v57 = vld [vmem:[%s1378_s11 + $0x10] sm:$0xff]  ;;  %v782_v1 = vld [vmem:[%s1378_s11 + $0x18] sm:$0xff] }
  0x18   : > { %1097 = vmatpush3.bf16.msra.mxu0 %v1201_v9  ;;  %1164 = vmatpush3.bf16.msra.mxu1 %v1201_v9  ;;  %v788_v45 = vld [vmem:[%s1378_s11 + $0x48] sm:$0xff]  ;;  %v789_v59 = vld [vmem:[%s1378_s11 + $0x50] sm:$0xff]  ;;  %v790_v3 = vld [vmem:[%s1378_s11 + $0x58] sm:$0xff] }
  0x19   : > { %1098 = vmatprep.subr.bf16.mxu0 %v1202_v10  ;;  %1157 = vmatprep.subr.bf16.mxu1 %v1202_v10 }
  0x1c   : > { %1099 = vmatpush3.bf16.msra.mxu0 %v1203_v13  ;;  %1165 = vmatpush3.bf16.msra.mxu1 %v1203_v13 }
  0x1d   : > { %1100 = vmatprep.subr.bf16.mxu0 %v1204_v14  ;;  %1158 = vmatprep.subr.bf16.mxu1 %v1204_v14 }
  0x20   : > { %1101 = vmatpush3.bf16.msra.mxu0 %v1205_v15  ;;  %1166 = vmatpush3.bf16.msra.mxu1 %v1205_v15  ;;  %v783_v15 = vld [vmem:[%s1378_s11 + $0x20] sm:$0xff] }
  0x21   : > { %1102 = vmatprep.subr.bf16.mxu0 %v1206_v16  ;;  %1159 = vmatprep.subr.bf16.mxu1 %v1206_v16 }
  0x24   : > { %1103 = vmatpush3.bf16.msra.mxu0 %v1207_v17  ;;  %1167 = vmatpush3.bf16.msra.mxu1 %v1207_v17  ;;  %v791_v17 = vld [vmem:[%s1378_s11 + $0x60] sm:$0xff] }
  0x27   : > { %584 = vmatmul.mubr.bf16.vlgmr.msra.gmra.mrb[0].mxu0 %v1208_v18  ;;  %616 = vmatmul.mubr.bf16.vlgmr.msra.gmra.mrb[0].mxu1 %v1211_v19 }
  0x28   : > { %591 = vmatprep.mubr.bf16.mxu0 %v1214_v20  ;;  %623 = vmatprep.mubr.bf16.mxu1 %v1216_v21 }
  0x2f   : > { %592 = vmatmul.mubr.bf16.gmra.mrb[4].mxu0 %v1218_v22  ;;  %624 = vmatmul.mubr.bf16.gmra.mrb[4].mxu1 %v1219_v23  ;;  %v784_v23 = vld [vmem:[%s1378_s11 + $0x28] sm:$0xff] }
  0x30   : > { %599 = vmatprep.mubr.bf16.mxu0 %v1220_v24  ;;  %631 = vmatprep.mubr.bf16.mxu1 %v1222_v25  ;;  %v792_v25 = vld [vmem:[%s1378_s11 + $0x68] sm:$0xff] }
  0x37   : > { %600 = vmatmul.mubr.bf16.gmra.mrb[8].mxu0 %v1224_v26  ;;  %632 = vmatmul.mubr.bf16.gmra.mrb[8].mxu1 %v1225_v27 }
  0x38   : > { %607 = vmatprep.mubr.bf16.mxu0 %v1226_v28  ;;  %639 = vmatprep.mubr.bf16.mxu1 %v1228_v29 }
  0x3f   : > { %608 = vmatmul.mubr.bf16.gmra.mrb[12].mxu0 %v1230_v30  ;;  %640 = vmatmul.mubr.bf16.gmra.mrb[12].mxu1 %v1231_v31 }
  0xfa   : > { %v1104_v32 = vpop.f32.mrb[0].mxu0  ;;  %v1128_v33 = vpop.f32.mrb[0].mxu1 }
  0xfb   : > { %v1105_v34 = vpop.f32.mrb[1].mxu0  ;;  %v1129_v36 = vpop.f32.mrb[1].mxu1 }
  0xfc   : > { %v1106_v38 = vadd.f32 %v1105_v34, %v1104_v32  ;;  %v1130_v39 = vadd.f32 %v1129_v36, %v1128_v33  ;;  %v1107_v40 = vpop.f32.mrb[2].mxu0  ;;  %v1131_v41 = vpop.f32.mrb[2].mxu1 }
  0xfd   : > { %v1108_v42 = vpop.f32.mrb[3].mxu0  ;;  %v1132_v44 = vpop.f32.mrb[3].mxu1 }
  0xfe   : > { %v795_v46 = vadd.f32 %v1106_v38, %v779_v35  ;;  %v803_v47 = vadd.f32 %v1130_v39, %v787_v37  ;;  %v1109_v48 = vadd.f32 %v1108_v42, %v1107_v40  ;;  %v1133_v49 = vadd.f32 %v1132_v44, %v1131_v41  ;;  %v785_v37 = vld [vmem:[%s1378_s11 + $0x30] sm:$0xff] }
 0x100   : > { %811 = vst [vmem:[%s1387_s15] sm:$0xff] %v795_v46  ;;  %819 = vst [vmem:[%s1387_s15 + $0x40] sm:$0xff] %v803_v47  ;;  %v1044_v50 = vpack.c.bf16 %v1109_v48, %v1106_v38  ;;  %v796_v51 = vadd.f32 %v1109_v48, %v780_v43  ;;  %v1064_v52 = vpack.c.bf16 %v1133_v49, %v1130_v39  ;;  %v793_v39 = vld [vmem:[%s1378_s11 + $0x70] sm:$0xff]  ;;  %v794_v47 = vld [vmem:[%s1378_s11 + $0x78] sm:$0xff] }
 0x101   : > { %v804_v53 = vadd.f32 %v1133_v49, %v788_v45  ;;  %v786_v45 = vld [vmem:[%s1378_s11 + $0x38] sm:$0xff] }
 0x102   : > { %1045 = vst [vmem:[%s1394_s20] sm:$0xff] %v1044_v50   ;;  %812 = vst [vmem:[%s1387_s15 + $0x8] sm:$0xff] %v796_v51  ;;  %v1110_v54 = vpop.f32.mrb[4].mxu0  ;;  %v1134_v55 = vpop.f32.mrb[4].mxu1 }
 0x103   : > { %1084 = vst [vmem:[%s1394_s20 + $0x20] sm:$0xff] %v1064_v52   ;;  %820 = vst [vmem:[%s1387_s15 + $0x48] sm:$0xff] %v804_v53  ;;  %v1111_v56 = vpop.f32.mrb[5].mxu0  ;;  %v1135_v58 = vpop.f32.mrb[5].mxu1 }
 0x104   : > { %v1112_v60 = vadd.f32 %v1111_v56, %v1110_v54  ;;  %v1136_v61 = vadd.f32 %v1135_v58, %v1134_v55  ;;  %v1113_v62 = vpop.f32.mrb[6].mxu0  ;;  %v1137_v63 = vpop.f32.mrb[6].mxu1 }
 0x105   : > { %v1114_v0 = vpop.f32.mrb[7].mxu0  ;;  %v1138_v2 = vpop.f32.mrb[7].mxu1 }
 0x106   : > { %v797_v4 = vadd.f32 %v1112_v60, %v781_v57  ;;  %v805_v5 = vadd.f32 %v1136_v61, %v789_v59  ;;  %v1115_v6 = vadd.f32 %v1114_v0, %v1113_v62  ;;  %v1139_v7 = vadd.f32 %v1138_v2, %v1137_v63 }
 0x108   : > { %813 = vst [vmem:[%s1387_s15 + $0x10] sm:$0xff] %v797_v4  ;;  %821 = vst [vmem:[%s1387_s15 + $0x50] sm:$0xff] %v805_v5  ;;  %v1049_v8 = vpack.c.bf16 %v1115_v6, %v1112_v60  ;;  %v798_v9 = vadd.f32 %v1115_v6, %v782_v1  ;;  %v1069_v10 = vpack.c.bf16 %v1139_v7, %v1136_v61 }
 0x109   : > { %v806_v11 = vadd.f32 %v1139_v7, %v790_v3 }
 0x10a   : > { %1081 = vst [vmem:[%s1394_s20 + $0x8] sm:$0xff] %v1049_v8   ;;  %814 = vst [vmem:[%s1387_s15 + $0x18] sm:$0xff] %v798_v9  ;;  %v1116_v12 = vpop.f32.mrb[8].mxu0  ;;  %v1140_v13 = vpop.f32.mrb[8].mxu1 }
 0x10b   : > { %1085 = vst [vmem:[%s1394_s20 + $0x28] sm:$0xff] %v1069_v10   ;;  %822 = vst [vmem:[%s1387_s15 + $0x58] sm:$0xff] %v806_v11  ;;  %v1117_v14 = vpop.f32.mrb[9].mxu0  ;;  %v1141_v16 = vpop.f32.mrb[9].mxu1 }
 0x10c   : > { %v1118_v18 = vadd.f32 %v1117_v14, %v1116_v12  ;;  %v1142_v19 = vadd.f32 %v1141_v16, %v1140_v13  ;;  %v1119_v20 = vpop.f32.mrb[10].mxu0  ;;  %v1143_v21 = vpop.f32.mrb[10].mxu1 }
 0x10d   : > { %v1120_v22 = vpop.f32.mrb[11].mxu0  ;;  %v1144_v24 = vpop.f32.mrb[11].mxu1 }
 0x10e   : > { %v799_v26 = vadd.f32 %v1118_v18, %v783_v15  ;;  %v807_v27 = vadd.f32 %v1142_v19, %v791_v17  ;;  %v1121_v28 = vadd.f32 %v1120_v22, %v1119_v20  ;;  %v1145_v29 = vadd.f32 %v1144_v24, %v1143_v21 }
 0x110   : > { %815 = vst [vmem:[%s1387_s15 + $0x20] sm:$0xff] %v799_v26  ;;  %823 = vst [vmem:[%s1387_s15 + $0x60] sm:$0xff] %v807_v27  ;;  %v1054_v30 = vpack.c.bf16 %v1121_v28, %v1118_v18  ;;  %v800_v31 = vadd.f32 %v1121_v28, %v784_v23  ;;  %v1074_v32 = vpack.c.bf16 %v1145_v29, %v1142_v19 }
 0x111   : > { %v808_v33 = vadd.f32 %v1145_v29, %v792_v25 }
 0x112   : > { %1082 = vst [vmem:[%s1394_s20 + $0x10] sm:$0xff] %v1054_v30   ;;  %816 = vst [vmem:[%s1387_s15 + $0x28] sm:$0xff] %v800_v31  ;;  %v1122_v34 = vpop.f32.mrb[12].mxu0  ;;  %v1146_v35 = vpop.f32.mrb[12].mxu1 }
 0x113   : > { %1086 = vst [vmem:[%s1394_s20 + $0x30] sm:$0xff] %v1074_v32   ;;  %824 = vst [vmem:[%s1387_s15 + $0x68] sm:$0xff] %v808_v33  ;;  %v1123_v36 = vpop.f32.mrb[13].mxu0  ;;  %v1147_v38 = vpop.f32.mrb[13].mxu1 }
 0x114   : > { %v1124_v40 = vadd.f32 %v1123_v36, %v1122_v34  ;;  %v1148_v41 = vadd.f32 %v1147_v38, %v1146_v35  ;;  %v1125_v42 = vpop.f32.mrb[14].mxu0  ;;  %v1149_v43 = vpop.f32.mrb[14].mxu1 }
 0x115   : > { %v1126_v44 = vpop.f32.mrb[15].mxu0  ;;  %v1150_v46 = vpop.f32.mrb[15].mxu1 }
 0x116   : > { %v801_v48 = vadd.f32 %v1124_v40, %v785_v37  ;;  %v809_v49 = vadd.f32 %v1148_v41, %v793_v39  ;;  %v1127_v50 = vadd.f32 %v1126_v44, %v1125_v42  ;;  %v1151_v51 = vadd.f32 %v1150_v46, %v1149_v43 }
 0x118   : > { %817 = vst [vmem:[%s1387_s15 + $0x30] sm:$0xff] %v801_v48  ;;  %825 = vst [vmem:[%s1387_s15 + $0x70] sm:$0xff] %v809_v49  ;;  %v1059_v52 = vpack.c.bf16 %v1127_v50, %v1124_v40  ;;  %v802_v53 = vadd.f32 %v1127_v50, %v786_v45  ;;  %v1079_v54 = vpack.c.bf16 %v1151_v51, %v1148_v41 }
 0x119   : > { %v810_v55 = vadd.f32 %v1151_v51, %v794_v47 }
 0x11a   : > { %1083 = vst [vmem:[%s1394_s20 + $0x18] sm:$0xff] %v1059_v52   ;;  %818 = vst [vmem:[%s1387_s15 + $0x38] sm:$0xff] %v802_v53 }
 0x11b   : > { %1087 = vst [vmem:[%s1394_s20 + $0x38] sm:$0xff] %v1079_v54   ;;  %826 = vst [vmem:[%s1387_s15 + $0x78] sm:$0xff] %v810_v55 }
 0x11c PF: > { %s15_s17 = sadd.s32 1, %s1254_s17   ;;  %s1446_s15 = smov %s1250_s16 }
 0x11d   : > { %p12_p5 = scmp.ge.s32.totalorder %s15_s17, 4   ;;  %s1447_s16 = smov %s1449_s18 }
 0x11f   :  { %14 = sbr.rel (!%p12_p5) target bundleno = 2 (0x2), region = 88 }

// kernel: lightgcn_forward.6
= control target key start
LH: loop header
LB: loop body
LE: loop exit
PB: predicated region body
PF: predicated region fallthrough
CT: control target
= control target key end

     0   :  { %10 = vsyncpa [#allocation4], 0  ;;  %s1651_s0 = inlined_call_operand.vmem [shape: bf16[256,256], index: 0, kind: input, shape index: {}]   ;;  %s1652_s1 = inlined_call_operand.vmem [shape: bf16[256,128], index: 1, kind: input, shape index: {}]   ;;  %s1653_s2 = inlined_call_operand.vmem [shape: f32[256,128], index: 2, kind: input, shape index: {}]   ;;  %s1654_s3 = inlined_call_operand.hbm [shape: bf16[256,128], index: 3, kind: output, shape index: {0}]   ;;  %s1655_s4 = inlined_call_operand.vmem [shape: f32[256,128], index: 4, kind: output, shape index: {1}]  }
   0x1   :  { %12 = vsyncpa [#allocation4 + $0x1], 0  ;;  %s1409_s15 = smov 0   ;;  %s1411_s16 = smov 0  }
   0x2   :  { %s1413_s17 = smov 0   ;;  %s1415_s18 = smov 0  }
   0x3   :  { %s1417_s19 = smov 0   ;;  %s1419_s20 = smov 0  }
   0x4 LB: > { %s992_s21 = sadd.s32 4294967295, %s1379_s20   ;;  %s993_s22 = sadd.s32 4294967294, %s1379_s20   ;;  %s1379_s20 = sphi %s1419_s20, %s18_s20   ;;  %s1375_s19 = sphi %s1417_s19, %s1662_s19   ;;  %s1371_s18 = sphi %s1415_s18, %s1661_s18   ;;  %s1367_s17 = sphi %s1413_s17, %s1660_s17   ;;  %s1363_s16 = sphi %s1411_s16, %s1659_s16   ;;  %s1359_s15 = sphi %s1409_s15, %s1658_s15  }
   0x5   : > { %s30_s23 = sadd.s32 1, %s1375_s19  ;;  %s117_s24 = sadd.s32 1, %s1367_s17 }
   0x6   : > { %p32_p0 = scmp.ge.s32.totalorder %s30_s23, 2  ;;  %p127_p1 = scmp.ne.s32.totalorder %s1367_s17, %s1363_s16 }
   0x7   : > { %p128_p2 = scmp.eq.s32.totalorder %s992_s21, 1  ;;  %p133_p3 = scmp.ne.s32.totalorder %s1363_s16, %s1359_s15 }
   0x8   : > { %s1664_s23 = smov (%p32_p0, %s30_s23), 0  ;;  %p134_p5 = scmp.eq.s32.totalorder %s993_s22, 1 }
   0x9   : > { %p1449_p4 = por %p128_p2, %p127_p1  ;;  %s114_s26 = ssub.s32 %s1375_s19, %s1664_s23 }
   0xa   : > { %p997_p6 = scmp.ge.s32.totalorder %s1379_s20, 1  ;;  %p115_p7 = scmp.eq.s32.totalorder %s114_s26, 0 }
   0xb   : > { %p1456_p8 = por %p134_p5, %p133_p3  ;;  %p211_p9 = scmp.lt.s32.totalorder %s1379_s20, 3 }
   0xc   : > { %s1462_s28 = scalar_select %p115_p7, %s1367_s17, %s117_s24  }
   0xd   : > { %p212_p10 = pnand %p997_p6, %p211_p9 }
   0xe   : > { %v1261_v0 = vld [vmem:[%s1652_s1 + $0x40] sm:$0xff] (!%p212_p10)   ;;  %s999_s5 = sshll.u32 (!%p212_p10), %s1371_s18, 4  ;;  %v1263_v2 = vld [vmem:[%s1652_s1 + $0x48] sm:$0xff] (!%p212_p10)   ;;  %v1265_v4 = vld [vmem:[%s1652_s1 + $0x50] sm:$0xff] (!%p212_p10)   ;;  %s247_s13 = sand.u32 (!%p212_p10), 1, %s1363_s16  }
   0xf   : > { %215 = sbr.rel (%p212_p10) target bundleno = 307 (0x133), region = 32  ;;  %v1262_v1 = vld [vmem:[%s1652_s1] sm:$0xff] (!%p212_p10)   ;;  %1124 = vmatprep.subr.bf16.mxu0 (!%p212_p10), %v1261_v0  ;;  %1188 = vmatprep.subr.bf16.mxu1 (!%p212_p10), %v1261_v0  ;;  %v1264_v3 = vld [vmem:[%s1652_s1 + $0x8] sm:$0xff] (!%p212_p10)   ;;  %p259_p11 = scmp.lt.s32.totalorder (!%p212_p10), %s999_s5, 31  ;;  %v1266_v5 = vld [vmem:[%s1652_s1 + $0x10] sm:$0xff] (!%p212_p10)  }
  0x10   : > { %1125 = vmatpush3.bf16.msra.mxu0 (!%p212_p10), %v1262_v1  ;;  %1196 = vmatpush3.bf16.msra.mxu1 (!%p212_p10), %v1262_v1  ;;  %v1267_v6 = vld [vmem:[%s1652_s1 + $0x58] sm:$0xff] (!%p212_p10)   ;;  %v1269_v8 = vld [vmem:[%s1652_s1 + $0x60] sm:$0xff] (!%p212_p10)   ;;  %v1271_v10 = vld [vmem:[%s1652_s1 + $0x68] sm:$0xff] (!%p212_p10)   ;;  %s1604_s7 = scalar_lea.sflag (!%p212_p10), [#allocation4], %s247_s13  ;;  %s1381_s9 = smov (!%p212_p10), [#allocation3]  }
  0x11   : > { %1126 = vmatprep.subr.bf16.mxu0 (!%p212_p10), %v1263_v2  ;;  %1189 = vmatprep.subr.bf16.mxu1 (!%p212_p10), %v1263_v2  ;;  %v1268_v7 = vld [vmem:[%s1652_s1 + $0x18] sm:$0xff] (!%p212_p10)   ;;  %v1270_v9 = vld [vmem:[%s1652_s1 + $0x20] sm:$0xff] (!%p212_p10)   ;;  %v1272_v13 = vld [vmem:[%s1652_s1 + $0x28] sm:$0xff] (!%p212_p10)   ;;  %s1305_s11 = sshll.u32 (!%p212_p10), %s1381_s9, 4  ;;  %s1306_s11 = int_to_ptr.vmem [resolvable:$false] %s1305_s11 }
  0x12   : > { %v1273_v14 = vld [vmem:[%s1652_s1 + $0x70] sm:$0xff] (!%p212_p10)   ;;  %v1275_v16 = vld [vmem:[%s1652_s1 + $0x78] sm:$0xff] (!%p212_p10)   ;;  %s1307_s12 = scalar_lea.vmem (!%p212_p10), %s1306_s11, 2048 }
  0x13   : > { %v1274_v15 = vld [vmem:[%s1652_s1 + $0x30] sm:$0xff] (!%p212_p10)   ;;  %v1276_v17 = vld [vmem:[%s1652_s1 + $0x38] sm:$0xff] (!%p212_p10)  }
  0x14   : > { %1127 = vmatpush3.bf16.msra.mxu0 (!%p212_p10), %v1264_v3  ;;  %1197 = vmatpush3.bf16.msra.mxu1 (!%p212_p10), %v1264_v3 }
  0x15   : > { %1128 = vmatprep.subr.bf16.mxu0 (!%p212_p10), %v1265_v4  ;;  %1190 = vmatprep.subr.bf16.mxu1 (!%p212_p10), %v1265_v4 }
  0x16   : > { %s1666_s5 = smov (!%p259_p11, %s999_s5), 31 }
  0x17   : > { %s1489_s30 = sshll.u32 %s1666_s5, 3 }
  0x18   : > { %1129 = vmatpush3.bf16.msra.mxu0 %v1266_v5  ;;  %1198 = vmatpush3.bf16.msra.mxu1 %v1266_v5  ;;  %s1498_s10 = scalar_lea.vmem %s1651_s0, %s1489_s30  ;;  %s1541_s5 = scalar_lea.vmem %s1653_s2, %s1489_s30 }
  0x19   : > { %1130 = vmatprep.subr.bf16.mxu0 %v1267_v6  ;;  %1191 = vmatprep.subr.bf16.mxu1 %v1267_v6  ;;  %v1279_v11 = vld [vmem:[%s1498_s10 + $0x4] ss:$8 sps:$4 sm:$0xff]   ;;  %v1277_v18 = vld [vmem:[%s1498_s10] ss:$8 sps:$4 sm:$0xff]   ;;  %v1283_v20 = vld [vmem:[%s1498_s10 + $0x14] ss:$8 sps:$4 sm:$0xff]   ;;  %s1554_s22 = scalar_lea.vmem %s1655_s4, %s1489_s30 }
  0x1a   : > { %v1282_v12 = vld [vmem:[%s1498_s10 + $0x44] ss:$8 sps:$4 sm:$0xff]   ;;  %581 = vmatprep.mubr.bf16.mxu0 %v1279_v11  ;;  %v1280_v19 = vld [vmem:[%s1498_s10 + $0x40] ss:$8 sps:$4 sm:$0xff]   ;;  %v1285_v21 = vld [vmem:[%s1498_s10 + $0x54] ss:$8 sps:$4 sm:$0xff]  }
  0x1b   : > { %613 = vmatprep.mubr.bf16.mxu1 %v1282_v12  ;;  %v1287_v22 = vld [vmem:[%s1498_s10 + $0x10] ss:$8 sps:$4 sm:$0xff]   ;;  %v1289_v24 = vld [vmem:[%s1498_s10 + $0x24] ss:$8 sps:$4 sm:$0xff]   ;;  %v1293_v26 = vld [vmem:[%s1498_s10 + $0x20] ss:$8 sps:$4 sm:$0xff]  }
  0x1c   : > { %1131 = vmatpush3.bf16.msra.mxu0 %v1268_v7  ;;  %1199 = vmatpush3.bf16.msra.mxu1 %v1268_v7  ;;  %v1288_v23 = vld [vmem:[%s1498_s10 + $0x50] ss:$8 sps:$4 sm:$0xff]   ;;  %v1291_v25 = vld [vmem:[%s1498_s10 + $0x64] ss:$8 sps:$4 sm:$0xff]   ;;  %v1294_v27 = vld [vmem:[%s1498_s10 + $0x60] ss:$8 sps:$4 sm:$0xff]  }
  0x1d   : > { %1132 = vmatprep.subr.bf16.mxu0 %v1269_v8  ;;  %1192 = vmatprep.subr.bf16.mxu1 %v1269_v8  ;;  %v1295_v28 = vld [vmem:[%s1498_s10 + $0x34] ss:$8 sps:$4 sm:$0xff]   ;;  %v1299_v30 = vld [vmem:[%s1498_s10 + $0x30] ss:$8 sps:$4 sm:$0xff]   ;;  %v777_v35 = vld [vmem:[%s1541_s5] sm:$0xff]  ;;  %s1076_s30 = sshll.u32 %s1371_s18, 10 }
  0x1e   : > { %v1297_v29 = vld [vmem:[%s1498_s10 + $0x74] ss:$8 sps:$4 sm:$0xff]   ;;  %v1300_v31 = vld [vmem:[%s1498_s10 + $0x70] ss:$8 sps:$4 sm:$0xff]   ;;  %v785_v37 = vld [vmem:[%s1541_s5 + $0x40] sm:$0xff]  ;;  %s998_s10 = sshll.u32 %s247_s13, 6  ;;  %s1593_s18 = scalar_lea.hbm %s1654_s3, %s1076_s30 }
  0x1f   : > { %v778_v43 = vld [vmem:[%s1541_s5 + $0x8] sm:$0xff]  ;;  %s1558_s24 = scalar_lea.vmem [#allocation3], %s998_s10  ;;  %v779_v61 = vld [vmem:[%s1541_s5 + $0x10] sm:$0xff]  ;;  %v780_v5 = vld [vmem:[%s1541_s5 + $0x18] sm:$0xff] }
  0x20   : > { %1133 = vmatpush3.bf16.msra.mxu0 %v1270_v9  ;;  %1200 = vmatpush3.bf16.msra.mxu1 %v1270_v9  ;;  %v786_v49 = vld [vmem:[%s1541_s5 + $0x48] sm:$0xff]  ;;  %v787_v63 = vld [vmem:[%s1541_s5 + $0x50] sm:$0xff]  ;;  %v788_v11 = vld [vmem:[%s1541_s5 + $0x58] sm:$0xff]  ;;  %s860_s26 = sshll.u32 %s1558_s24, 4  ;;  %s1595_s26 = int_to_ptr.vmem [resolvable:$true] %s860_s26 }
  0x21   : > { %1134 = vmatprep.subr.bf16.mxu0 %v1271_v10  ;;  %1193 = vmatprep.subr.bf16.mxu1 %v1271_v10  ;;  %s1301_s8 = scalar_lea.vmem %s1595_s26, 1024  ;;  %p1308_p1 = scmp.lt.s32.totalorder %s1595_s26, %s1306_s11 }
  0x22   : > { %p1302_p12 = scmp.ne.s32.totalorder %s1595_s26, %s1301_s8  ;;  %p1309_p2 = scmp.lt.s32.totalorder %s1307_s12, %s1301_s8 }
  0x24   : > { %1135 = vmatpush3.bf16.msra.mxu0 %v1272_v13  ;;  %1201 = vmatpush3.bf16.msra.mxu1 %v1272_v13  ;;  %p1303_p13 = pnand %p1302_p12, %p1449_p4  ;;  %p1310_p3 = por %p1309_p2, %p1308_p1 }
  0x25   : > { %1136 = vmatprep.subr.bf16.mxu0 %v1273_v14  ;;  %1194 = vmatprep.subr.bf16.mxu1 %v1273_v14 }
  0x26   : > { %p1304_p0 = pneg %p1303_p13 }
  0x28   : > { %1137 = vmatpush3.bf16.msra.mxu0 %v1274_v15  ;;  %1202 = vmatpush3.bf16.msra.mxu1 %v1274_v15  ;;  %p1311_p5 = pnand %p1310_p3, %p1304_p0 }
  0x29   : > { %1138 = vmatprep.subr.bf16.mxu0 %v1275_v16  ;;  %1195 = vmatprep.subr.bf16.mxu1 %v1275_v16 }
  0x2c   : > { %1139 = vmatpush3.bf16.msra.mxu0 %v1276_v17  ;;  %1203 = vmatpush3.bf16.msra.mxu1 %v1276_v17 }
  0x2f   : > { %582 = vmatmul.mubr.bf16.vlgmr.msra.gmra.mrb[0].mxu0 %v1277_v18  ;;  %614 = vmatmul.mubr.bf16.vlgmr.msra.gmra.mrb[0].mxu1 %v1280_v19 }
  0x30   : > { %589 = vmatprep.mubr.bf16.mxu0 %v1283_v20  ;;  %621 = vmatprep.mubr.bf16.mxu1 %v1285_v21 }
  0x37   : > { %590 = vmatmul.mubr.bf16.gmra.mrb[4].mxu0 %v1287_v22  ;;  %622 = vmatmul.mubr.bf16.gmra.mrb[4].mxu1 %v1288_v23  ;;  %v781_v23 = vld [vmem:[%s1541_s5 + $0x20] sm:$0xff] }
  0x38   : > { %597 = vmatprep.mubr.bf16.mxu0 %v1289_v24  ;;  %629 = vmatprep.mubr.bf16.mxu1 %v1291_v25  ;;  %v789_v25 = vld [vmem:[%s1541_s5 + $0x60] sm:$0xff] }
  0x3f   : > { %598 = vmatmul.mubr.bf16.gmra.mrb[8].mxu0 %v1293_v26  ;;  %630 = vmatmul.mubr.bf16.gmra.mrb[8].mxu1 %v1294_v27 }
  0x40   : > { %605 = vmatprep.mubr.bf16.mxu0 %v1295_v28  ;;  %637 = vmatprep.mubr.bf16.mxu1 %v1297_v29 }
  0x47   : > { %606 = vmatmul.mubr.bf16.gmra.mrb[12].mxu0 %v1299_v30  ;;  %638 = vmatmul.mubr.bf16.gmra.mrb[12].mxu1 %v1300_v31  ;;  %v782_v31 = vld [vmem:[%s1541_s5 + $0x28] sm:$0xff] }
 0x102   : > { %v1140_v32 = vpop.f32.mrb[0].mxu0  ;;  %v1164_v33 = vpop.f32.mrb[0].mxu1 }
 0x103   : > { %v1141_v34 = vpop.f32.mrb[1].mxu0  ;;  %v1165_v36 = vpop.f32.mrb[1].mxu1 }
 0x104   : > { %v1142_v38 = vadd.f32 %v1141_v34, %v1140_v32  ;;  %v1166_v39 = vadd.f32 %v1165_v36, %v1164_v33  ;;  %v1143_v40 = vpop.f32.mrb[2].mxu0  ;;  %v1167_v41 = vpop.f32.mrb[2].mxu1 }
 0x105   : > { %v1144_v42 = vpop.f32.mrb[3].mxu0  ;;  %v1168_v44 = vpop.f32.mrb[3].mxu1 }
 0x106   : > { %v793_v45 = vadd.f32 %v1142_v38, %v777_v35  ;;  %v801_v46 = vadd.f32 %v1166_v39, %v785_v37  ;;  %v1145_v47 = vadd.f32 %v1144_v42, %v1143_v40  ;;  %v1169_v48 = vadd.f32 %v1168_v44, %v1167_v41  ;;  %v790_v37 = vld [vmem:[%s1541_s5 + $0x68] sm:$0xff] }
 0x108   : > { %v809_v50 = vmul.f32 0.25, %v793_v45  ;;  %v817_v51 = vmul.f32 0.25, %v801_v46  ;;  %v1080_v52 = vpack.c.bf16 %v1145_v47, %v1142_v38  ;;  %v794_v53 = vadd.f32 %v1145_v47, %v778_v43 }
 0x109   : > { %v1100_v54 = vpack.c.bf16 %v1169_v48, %v1166_v39  ;;  %v802_v55 = vadd.f32 %v1169_v48, %v786_v49  ;;  %v783_v49 = vld [vmem:[%s1541_s5 + $0x30] sm:$0xff] }
 0x10a   : > { %825 = vst [vmem:[%s1554_s22] sm:$0xff] %v809_v50  ;;  %833 = vst [vmem:[%s1554_s22 + $0x40] sm:$0xff] %v817_v51  ;;  %v810_v56 = vmul.f32 0.25, %v794_v53  ;;  %v1146_v57 = vpop.f32.mrb[4].mxu0  ;;  %v1170_v58 = vpop.f32.mrb[4].mxu1  ;;  %v791_v51 = vld [vmem:[%s1541_s5 + $0x70] sm:$0xff] }
 0x10b   : > { %1081 = vst [vmem:[%s1558_s24] sm:$0xff] %v1080_v52   ;;  %1120 = vst [vmem:[%s1558_s24 + $0x20] sm:$0xff] %v1100_v54   ;;  %v818_v59 = vmul.f32 0.25, %v802_v55  ;;  %v1147_v60 = vpop.f32.mrb[5].mxu0  ;;  %v1171_v62 = vpop.f32.mrb[5].mxu1 }
 0x10c   : > { %826 = vst [vmem:[%s1554_s22 + $0x8] sm:$0xff] %v810_v56  ;;  %v1148_v0 = vadd.f32 %v1147_v60, %v1146_v57  ;;  %v1172_v1 = vadd.f32 %v1171_v62, %v1170_v58  ;;  %v1149_v2 = vpop.f32.mrb[6].mxu0  ;;  %v1173_v3 = vpop.f32.mrb[6].mxu1  ;;  %v784_v57 = vld [vmem:[%s1541_s5 + $0x38] sm:$0xff] }
 0x10d   : > { %834 = vst [vmem:[%s1554_s22 + $0x48] sm:$0xff] %v818_v59  ;;  %v1150_v4 = vpop.f32.mrb[7].mxu0  ;;  %v1174_v6 = vpop.f32.mrb[7].mxu1 }
 0x10e   : > { %v795_v7 = vadd.f32 %v1148_v0, %v779_v61  ;;  %v803_v8 = vadd.f32 %v1172_v1, %v787_v63  ;;  %v1151_v9 = vadd.f32 %v1150_v4, %v1149_v2  ;;  %v1175_v10 = vadd.f32 %v1174_v6, %v1173_v3  ;;  %v792_v63 = vld [vmem:[%s1541_s5 + $0x78] sm:$0xff] }
 0x110   : > { %v811_v12 = vmul.f32 0.25, %v795_v7  ;;  %v819_v13 = vmul.f32 0.25, %v803_v8  ;;  %v1085_v14 = vpack.c.bf16 %v1151_v9, %v1148_v0  ;;  %v796_v15 = vadd.f32 %v1151_v9, %v780_v5 }
 0x111   : > { %v1105_v16 = vpack.c.bf16 %v1175_v10, %v1172_v1  ;;  %v804_v17 = vadd.f32 %v1175_v10, %v788_v11 }
 0x112   : > { %827 = vst [vmem:[%s1554_s22 + $0x10] sm:$0xff] %v811_v12  ;;  %835 = vst [vmem:[%s1554_s22 + $0x50] sm:$0xff] %v819_v13  ;;  %v812_v18 = vmul.f32 0.25, %v796_v15  ;;  %v1152_v19 = vpop.f32.mrb[8].mxu0  ;;  %v1176_v20 = vpop.f32.mrb[8].mxu1 }
 0x113   : > { %1117 = vst [vmem:[%s1558_s24 + $0x8] sm:$0xff] %v1085_v14   ;;  %1121 = vst [vmem:[%s1558_s24 + $0x28] sm:$0xff] %v1105_v16   ;;  %v820_v21 = vmul.f32 0.25, %v804_v17  ;;  %v1153_v22 = vpop.f32.mrb[9].mxu0  ;;  %v1177_v24 = vpop.f32.mrb[9].mxu1 }
 0x114   : > { %828 = vst [vmem:[%s1554_s22 + $0x18] sm:$0xff] %v812_v18  ;;  %v1154_v26 = vadd.f32 %v1153_v22, %v1152_v19  ;;  %v1178_v27 = vadd.f32 %v1177_v24, %v1176_v20  ;;  %v1155_v28 = vpop.f32.mrb[10].mxu0  ;;  %v1179_v29 = vpop.f32.mrb[10].mxu1 }
 0x115   : > { %836 = vst [vmem:[%s1554_s22 + $0x58] sm:$0xff] %v820_v21  ;;  %v1156_v30 = vpop.f32.mrb[11].mxu0  ;;  %v1180_v32 = vpop.f32.mrb[11].mxu1 }
 0x116   : > { %v797_v33 = vadd.f32 %v1154_v26, %v781_v23  ;;  %v805_v34 = vadd.f32 %v1178_v27, %v789_v25  ;;  %v1157_v35 = vadd.f32 %v1156_v30, %v1155_v28  ;;  %v1181_v36 = vadd.f32 %v1180_v32, %v1179_v29 }
 0x118   : > { %v813_v38 = vmul.f32 0.25, %v797_v33  ;;  %v821_v39 = vmul.f32 0.25, %v805_v34  ;;  %v1090_v40 = vpack.c.bf16 %v1157_v35, %v1154_v26  ;;  %v798_v41 = vadd.f32 %v1157_v35, %v782_v31 }
 0x119   : > { %v1110_v42 = vpack.c.bf16 %v1181_v36, %v1178_v27  ;;  %v806_v43 = vadd.f32 %v1181_v36, %v790_v37 }
 0x11a   : > { %829 = vst [vmem:[%s1554_s22 + $0x20] sm:$0xff] %v813_v38  ;;  %837 = vst [vmem:[%s1554_s22 + $0x60] sm:$0xff] %v821_v39  ;;  %v814_v44 = vmul.f32 0.25, %v798_v41  ;;  %v1158_v45 = vpop.f32.mrb[12].mxu0  ;;  %v1182_v46 = vpop.f32.mrb[12].mxu1 }
 0x11b   : > { %1118 = vst [vmem:[%s1558_s24 + $0x10] sm:$0xff] %v1090_v40   ;;  %1122 = vst [vmem:[%s1558_s24 + $0x30] sm:$0xff] %v1110_v42   ;;  %v822_v47 = vmul.f32 0.25, %v806_v43  ;;  %v1159_v48 = vpop.f32.mrb[13].mxu0  ;;  %v1183_v50 = vpop.f32.mrb[13].mxu1 }
 0x11c   : > { %830 = vst [vmem:[%s1554_s22 + $0x28] sm:$0xff] %v814_v44  ;;  %v1160_v52 = vadd.f32 %v1159_v48, %v1158_v45  ;;  %v1184_v53 = vadd.f32 %v1183_v50, %v1182_v46  ;;  %v1161_v54 = vpop.f32.mrb[14].mxu0  ;;  %v1185_v55 = vpop.f32.mrb[14].mxu1 }
 0x11d   : > { %838 = vst [vmem:[%s1554_s22 + $0x68] sm:$0xff] %v822_v47  ;;  %v1162_v56 = vpop.f32.mrb[15].mxu0  ;;  %v1186_v58 = vpop.f32.mrb[15].mxu1 }
 0x11e   : > { %v799_v59 = vadd.f32 %v1160_v52, %v783_v49  ;;  %v807_v60 = vadd.f32 %v1184_v53, %v791_v51  ;;  %v1163_v61 = vadd.f32 %v1162_v56, %v1161_v54  ;;  %v1187_v62 = vadd.f32 %v1186_v58, %v1185_v55 }
 0x120   : > { %v815_v0 = vmul.f32 0.25, %v799_v59  ;;  %v823_v1 = vmul.f32 0.25, %v807_v60  ;;  %v1095_v2 = vpack.c.bf16 %v1163_v61, %v1160_v52  ;;  %v800_v3 = vadd.f32 %v1163_v61, %v784_v57 }
 0x121   : > { %v1115_v4 = vpack.c.bf16 %v1187_v62, %v1184_v53  ;;  %v808_v5 = vadd.f32 %v1187_v62, %v792_v63 }
 0x122   : > { %831 = vst [vmem:[%s1554_s22 + $0x30] sm:$0xff] %v815_v0  ;;  %839 = vst [vmem:[%s1554_s22 + $0x70] sm:$0xff] %v823_v1  ;;  %v816_v6 = vmul.f32 0.25, %v800_v3 }
 0x123   : > { %1119 = vst [vmem:[%s1558_s24 + $0x18] sm:$0xff] %v1095_v2   ;;  %1123 = vst [vmem:[%s1558_s24 + $0x38] sm:$0xff] %v1115_v4   ;;  %v824_v7 = vmul.f32 0.25, %v808_v5 }
 0x124   : > { %832 = vst [vmem:[%s1554_s22 + $0x38] sm:$0xff] %v816_v6 }
 0x125   : > { %1314 = shalt.err (!%p1311_p5)
}
 0x126   : > { %s1315_s5 = scalar_lea.hbm %s1593_s18, 1024  ;;  %s1319_s14 = scalar_lea.hbm %s1654_s3, 2048 }
 0x127   : > { %p1316_p6 = scmp.ne.s32.totalorder %s1593_s18, %s1315_s5  ;;  %p1320_p10 = scmp.lt.u32.totalorder %s1593_s18, %s1654_s3 }
 0x128   : > { %p1321_p11 = scmp.lt.u32.totalorder %s1319_s14, %s1315_s5  ;;  %p1323_p13 = scmp.lt.u32.totalorder %s1315_s5, %s1593_s18 }
 0x129   : > { %p1317_p7 = pnand %p1316_p6, %p1449_p4 }
 0x12a   : > { %p1322_p12 = por %p1321_p11, %p1320_p10 }
 0x12b   : > { %p1318_p9 = pneg %p1317_p7 }
 0x12c   : > { %p1324_p0 = por %p1323_p13, %p1322_p12 }
 0x12e   : > { %p1325_p1 = pnand %p1324_p0, %p1318_p9 }
 0x130   : > { %1328 = shalt.err (!%p1325_p1)
}
 0x131   : > { %s1382_s30 = smov 64   ;;  %s1383_s29 = smov 4   ;;  %840 = vst [vmem:[%s1554_s22 + $0x78] sm:$0xff] %v824_v7 }
 0x132   : > { %1204 = dma.vmem_to_hbm [thread:$0]  (%p1449_p4), %s1595_s26, 1024, %s1593_s18, %s1604_s7, %s1382_s30, %s1382_s30, %s1383_s29  }
 0x133 PF: > { %p1210_p2 = scmp.ge.s32.totalorder %s1379_s20, 2  ;;  %s879_s6 = sand.u32 1, %s1359_s15  }
 0x134   : > { %s880_s8 = scalar_lea.sflag [#allocation4], %s879_s6 }
 0x135   : > { %p1207_p3 = pnand %p1210_p2, %p1456_p8 }
 0x137   : > { %1354 = dma.done.wait (!%p1207_p3), %s880_s8, 1024  }
 0x138   : > { %1356 = vsyncadd (!%p1207_p3), %s880_s8, 4294966272  ;;  %s18_s20 = sadd.s32 1, %s1379_s20   ;;  %s1658_s15 = smov %s1363_s16 }
 0x139   : > { %p15_p5 = scmp.ge.s32.totalorder %s18_s20, 4   ;;  %s1659_s16 = smov %s1367_s17 }
 0x13a   : > { %s1660_s17 = smov %s1462_s28  ;;  %s1661_s18 = smov %s1375_s19 }
 0x13b   : > { %s1662_s19 = smov %s1664_s23  ;;  %17 = sbr.rel (!%p15_p5) target bundleno = 4 (0x4), region = 93 }
 0x142   :  { %893 = vsyncpa [#allocation4], 1 }
 0x143   :  { %895 = vsyncpa [#allocation4 + $0x1], 1 }

</bundles_post_ra>
